<compile_context>
chip_gen: v7x
topology: tpu7x:2x2x1
jax: 0.10.0
libtpu: 0.0.40
codegen_flags: <defaults>
</compile_context>

<pallas_src>
import functools

import jax
import jax.numpy as jnp
from jax.experimental import pallas as pl
from jax.experimental.pallas import tpu as pltpu

_MIB = 1024 * 1024


# ---------------------------------------------------------------------------
# Budgets derived from the chip.
# ---------------------------------------------------------------------------
def _vmem_limit_bytes():
    """Scoped-VMEM request derived from the chip's physical VMEM capacity."""
    cap = None
    try:
        cap = int(pltpu.get_tpu_info().vmem_capacity_bytes)
    except Exception:  # info query unavailable -> conservative default
        cap = None
    if not cap or cap <= 0:
        cap = 64 * _MIB  # v7x per-core VMEM (most restrictive current part)
    # Half of physical, clamped: 32 MiB on v7x, 64 MiB on v5e/v6e.
    return int(min(96 * _MIB, max(32 * _MIB, cap // 2)))


def _max_tile_elems(vmem_limit, itemsize, *, fused):
    """Max elements per grid-step block.

    Per-element VMEM footprint: in + out blocks double-buffered (2x each) in
    the activation dtype, plus in-kernel f32 temps (~3 x-sized live for the
    fused kernel, ~2 for the streaming kernels).
    """
    per_elem = 4 * itemsize + (12 if fused else 8)
    return max(64 * 1024, vmem_limit // per_elem)


# ---------------------------------------------------------------------------
# Tile selection.
# ---------------------------------------------------------------------------
def _c_tile_options(C):
    """Legal channel tiles: multiples of 8 dividing C, or the full C."""
    if C <= 8 or C % 8 != 0:
        return [C]
    return [ct for ct in range(8, C + 1, 8) if C % ct == 0]


def _pick_fused_c_tile(N, C, L, max_elems):
    """Largest channel tile such that an (N, c_tile, H*W) block fits; None if
    even the smallest legal tile does not fit (-> two-pass path)."""
    opts = [ct for ct in _c_tile_options(C) if N * ct * L <= max_elems]
    if not opts:
        return None
    # Prefer >= 2 channel tiles (v7x megacore + DMA/compute overlap) as long
    # as each tile keeps a reasonable size.
    multi = [ct for ct in opts if ct <= C // 2]
    if multi and N * multi[-1] * L >= 64 * 1024:
        return multi[-1]
    return opts[-1]


def _pick_stream_tiles(C, L, max_elems):
    """(c_tile, lane_tile) for the two-pass path.

    Prefers a full-H*W lane block (no ragged mask needed); falls back to
    128-multiple lane tiles with a cdiv grid for very large spatial sizes.
    """
    opts = _c_tile_options(C)
    full_l = [ct for ct in opts if ct * L <= max_elems]
    if full_l:
        return full_l[-1], L
    ct = opts[0]
    lt = max(128, (max_elems // ct) // 128 * 128)
    lt = min(lt, pl.cdiv(L, 128) * 128)
    return ct, lt


# ---------------------------------------------------------------------------
# Fused single-pass kernel (stats + normalize while x is resident in VMEM).
# Grid is over channel tiles ("parallel"); block = (N, c_tile, H*W).
# Centered variance (numerically safe) since x is resident anyway.
# ---------------------------------------------------------------------------
def _fused_bn_kernel(x_ref, gamma_ref, beta_ref, o_ref, *, count, eps):
    xb = x_ref[...].astype(jnp.float32)                        # (N, ct, L)
    s = jnp.sum(jnp.sum(xb, axis=2, keepdims=True), axis=0, keepdims=True)
    mean = s / count                                           # (1, ct, 1)
    d = xb - mean
    var = jnp.sum(jnp.sum(d * d, axis=2, keepdims=True), axis=0,
                  keepdims=True) / count                       # (1, ct, 1)
    inv_std = jax.lax.rsqrt(var + eps)
    scale = gamma_ref[...] * inv_std                           # (1, ct, 1)
    o_ref[...] = (d * scale + beta_ref[...]).astype(o_ref.dtype)


def _fused_call(x3, gamma3, beta3, *, c_tile, count, eps, vmem_limit):
    N, C, L = x3.shape
    n_cb = C // c_tile
    kernel = functools.partial(_fused_bn_kernel, count=count, eps=eps)
    # Note: when n_cb == 1 double-buffering buys nothing; the element budget
    # already accounts for it, so we keep the default pipeline mode.
    return pl.pallas_call(
        kernel,
        out_shape=jax.ShapeDtypeStruct((N, C, L), x3.dtype),
        grid_spec=pltpu.PrefetchScalarGridSpec(
            num_scalar_prefetch=0,
            grid=(n_cb,),
            in_specs=[
                pl.BlockSpec((N, c_tile, L), lambda cb: (0, cb, 0)),
                pl.BlockSpec((1, c_tile, 1), lambda cb: (0, cb, 0)),
                pl.BlockSpec((1, c_tile, 1), lambda cb: (0, cb, 0)),
            ],
            out_specs=pl.BlockSpec((N, c_tile, L), lambda cb: (0, cb, 0)),
        ),
        compiler_params=pltpu.CompilerParams(
            dimension_semantics=("parallel",),
            vmem_limit_bytes=vmem_limit),
    )(x3, gamma3, beta3)


# ---------------------------------------------------------------------------
# Pass 1 (large activations): per-(n, channel) sum / sum-of-squares.
# Grid (N, C-tiles, L-tiles); N & C "parallel", L (reduction) last "arbitrary".
# The ragged last lane tile (only present for huge H*W) is masked here; input
# lanes beyond H*W are undefined, NOT zero.
# ---------------------------------------------------------------------------
def _stats_kernel(x_ref, sum_ref, sq_ref, *, l_true, lane_tile, ragged):
    lb = pl.program_id(2)

    @pl.when(lb == 0)
    def _():
        sum_ref[...] = jnp.zeros_like(sum_ref)
        sq_ref[...] = jnp.zeros_like(sq_ref)

    xb = x_ref[...].astype(jnp.float32)                        # (1, ct, lt)
    if ragged:
        lane = jax.lax.broadcasted_iota(jnp.int32, xb.shape, 2)
        xb = jnp.where(lb * lane_tile + lane < l_true, xb, 0.0)
    sum_ref[...] += jnp.sum(xb, axis=2, keepdims=True)         # (1, ct, 1)
    sq_ref[...] += jnp.sum(xb * xb, axis=2, keepdims=True)


# ---------------------------------------------------------------------------
# Pass 2: elementwise normalize with precomputed per-channel scale/shift.
# Fully parallel grid; no mask needed (OOB output lanes are dropped).
# ---------------------------------------------------------------------------
def _normalize_kernel(x_ref, scale_ref, shift_ref, o_ref):
    xb = x_ref[...].astype(jnp.float32)                        # (1, ct, lt)
    o_ref[...] = (xb * scale_ref[...] + shift_ref[...]).astype(o_ref.dtype)


def _two_pass_call(x3, gamma3, beta3, *, count, eps, max_elems, vmem_limit):
    N, C, L = x3.shape
    ct, lt = _pick_stream_tiles(C, L, max_elems)
    n_cb = C // ct
    n_lb = pl.cdiv(L, lt)
    ragged = (n_lb * lt != L)

    stats_kernel = functools.partial(_stats_kernel, l_true=L, lane_tile=lt,
                                     ragged=ragged)
    sums, sqs = pl.pallas_call(
        stats_kernel,
        out_shape=(jax.ShapeDtypeStruct((N, C, 1), jnp.float32),
                   jax.ShapeDtypeStruct((N, C, 1), jnp.float32)),
        grid_spec=pltpu.PrefetchScalarGridSpec(
            num_scalar_prefetch=0,
            grid=(N, n_cb, n_lb),
            in_specs=[pl.BlockSpec((1, ct, lt), lambda n, cb, lb: (n, cb, lb))],
            out_specs=(pl.BlockSpec((1, ct, 1), lambda n, cb, lb: (n, cb, 0)),
                       pl.BlockSpec((1, ct, 1), lambda n, cb, lb: (n, cb, 0))),
        ),
        compiler_params=pltpu.CompilerParams(
            dimension_semantics=("parallel", "parallel", "arbitrary"),
            vmem_limit_bytes=vmem_limit),
    )(x3)

    # Tiny XLA combine: per-channel mean/var -> scale/shift (hoisted out of
    # pass 2).  E[x^2] - E[x]^2 in f32, clamped against cancellation.
    # TODO(synk): switch to a shifted/Welford accumulation if inputs are far
    # from zero-centered at very large N*H*W.
    sum_c = jnp.sum(sums[:, :, 0], axis=0)                     # (C,)
    sq_c = jnp.sum(sqs[:, :, 0], axis=0)                       # (C,)
    mean = sum_c / count
    var = jnp.maximum(sq_c / count - mean * mean, 0.0)
    inv_std = jax.lax.rsqrt(var + eps)
    g = gamma3[0, :, 0]
    b = beta3[0, :, 0]
    scale = (g * inv_std).reshape(1, C, 1).astype(jnp.float32)
    shift = (b - mean * g * inv_std).reshape(1, C, 1).astype(jnp.float32)

    y3 = pl.pallas_call(
        _normalize_kernel,
        out_shape=jax.ShapeDtypeStruct((N, C, L), x3.dtype),
        grid_spec=pltpu.PrefetchScalarGridSpec(
            num_scalar_prefetch=0,
            grid=(N, n_cb, n_lb),
            in_specs=[
                pl.BlockSpec((1, ct, lt), lambda n, cb, lb: (n, cb, lb)),
                pl.BlockSpec((1, ct, 1), lambda n, cb, lb: (0, cb, 0)),
                pl.BlockSpec((1, ct, 1), lambda n, cb, lb: (0, cb, 0)),
            ],
            out_specs=pl.BlockSpec((1, ct, lt), lambda n, cb, lb: (n, cb, lb)),
        ),
        compiler_params=pltpu.CompilerParams(
            dimension_semantics=("parallel", "parallel", "parallel"),
            vmem_limit_bytes=vmem_limit),
    )(x3, scale, shift)
    return y3


# ---------------------------------------------------------------------------
# Public wrapper.
# ---------------------------------------------------------------------------
def custom_batchnorm(x_nchw, gamma, beta, *, eps=1e-5, force_two_pass=False,
                     max_tile_elems=None):
    """BatchNorm2d forward (training-mode batch stats) via Pallas TPU kernels.

    x_nchw: (N, C, H, W); gamma, beta: (C,) affine params of the BN selected
    by CustomBatchNorm's bitwidth bookkeeping (host-side control flow).
    Returns (N, C, H, W) with the same dtype as x_nchw.
    """
    N, C, H, W = x_nchw.shape
    L = H * W

    # NCHW -> (N, C, H*W): free contiguous reshape, H*W on the lane axis.
    # No host-side padding / slicing; ragged tiles are handled in-kernel.
    x3 = x_nchw.reshape(N, C, L)
    gamma3 = gamma.reshape(1, C, 1).astype(jnp.float32)
    beta3 = beta.reshape(1, C, 1).astype(jnp.float32)
    count = float(N * L)

    itemsize = jnp.dtype(x_nchw.dtype).itemsize
    vmem_limit = _vmem_limit_bytes()
    fused_elems = (max_tile_elems if max_tile_elems is not None
                   else _max_tile_elems(vmem_limit, itemsize, fused=True))
    stream_elems = (max_tile_elems if max_tile_elems is not None
                    else _max_tile_elems(vmem_limit, itemsize, fused=False))

    c_tile = None if force_two_pass else _pick_fused_c_tile(N, C, L, fused_elems)
    if c_tile is not None:
        y3 = _fused_call(x3, gamma3, beta3, c_tile=c_tile, count=count,
                         eps=eps, vmem_limit=vmem_limit)
    else:
        y3 = _two_pass_call(x3, gamma3, beta3, count=count, eps=eps,
                            max_elems=stream_elems, vmem_limit=vmem_limit)
    return y3.reshape(N, C, H, W)


def _reference_batchnorm(x_nchw, gamma, beta, eps=1e-5):
    mean = jnp.mean(x_nchw, axis=(0, 2, 3), keepdims=True)
    var = jnp.mean((x_nchw - mean) ** 2, axis=(0, 2, 3), keepdims=True)
    g = gamma.reshape(1, -1, 1, 1)
    b = beta.reshape(1, -1, 1, 1)
    return (x_nchw - mean) * jax.lax.rsqrt(var + eps) * g + b


if __name__ == "__main__":
    key = jax.random.PRNGKey(0)
    kx, kg, kb, kx2, kx3 = jax.random.split(key, 5)

    # Shapes consistent with CustomBatchNorm(out_channels=4) on a small input.
    N, C, H, W = 2, 4, 16, 16
    x = jax.random.normal(kx, (N, C, H, W), dtype=jnp.float32) * 2.0 + 0.5
    # PyTorch default init is gamma=1, beta=0; perturb so affine is exercised.
    gamma = jnp.ones((C,), jnp.float32) + 0.1 * jax.random.normal(kg, (C,))
    beta = 0.1 * jax.random.normal(kb, (C,))

    # 1) Fused single-pass path (x resident in VMEM, channel-parallel grid).
    y = jax.block_until_ready(custom_batchnorm(x, gamma, beta))
    y_ref = _reference_batchnorm(x, gamma, beta)
    assert y.shape == (N, C, H, W)
    assert jnp.allclose(y, y_ref, atol=1e-4, rtol=1e-4), "fused path mismatch"

    # 2) Two-pass path with full-H*W lane blocks (H*W = 100, NOT a multiple of
    #    128, and no host-side padding) and a non-zero-centered input.
    x2 = jax.random.normal(kx2, (2, 4, 10, 10), dtype=jnp.float32) - 1.5
    y2 = jax.block_until_ready(
        custom_batchnorm(x2, gamma, beta, force_two_pass=True))
    y2_ref = _reference_batchnorm(x2, gamma, beta)
    assert y2.shape == x2.shape
    assert jnp.allclose(y2, y2_ref, atol=1e-4, rtol=1e-4), "two-pass mismatch"

    # 3) Two-pass path with ragged 128-lane tiles (tiny forced tile budget),
    #    exercising the in-kernel stats mask and dropped OOB output writes.
    C3 = 8
    g3 = jnp.ones((C3,), jnp.float32) + 0.1 * jax.random.normal(kg, (C3,))
    b3 = 0.1 * jax.random.normal(kb, (C3,))
    x3 = jax.random.normal(kx3, (2, C3, 20, 20), dtype=jnp.float32) + 0.7
    y3 = jax.block_until_ready(
        custom_batchnorm(x3, g3, b3, force_two_pass=True, max_tile_elems=1024))
    y3_ref = _reference_batchnorm(x3, g3, b3)
    assert y3.shape == x3.shape
    assert jnp.allclose(y3, y3_ref, atol=1e-4, rtol=1e-4), "ragged two-pass mismatch"

    print("KERNEL_OK")
</pallas_src>

<mosaic_0001>
module attributes {stable_mosaic.version = 11 : i64} {
  func.func @_fused_bn_kernel(%arg0: i32, %arg1: memref<2x4x256xf32, #tpu.memory_space<vmem>>, %arg2: memref<1x4x1xf32, #tpu.memory_space<vmem>>, %arg3: memref<1x4x1xf32, #tpu.memory_space<vmem>>, %arg4: memref<2x4x256xf32, #tpu.memory_space<vmem>>) attributes {dimension_semantics = [#tpu.dimension_semantics<parallel>], iteration_bounds = array<i64: 1>, scalar_prefetch = 0 : i64, scratch_operands = 0 : i64, tpu.core_type = #tpu.core_type<tc>, window_params = [{transform_indices = @transform_0, window_bounds = array<i64: 2, 4, 256>}, {transform_indices = @transform_1, window_bounds = array<i64: 1, 4, 1>}, {transform_indices = @transform_2, window_bounds = array<i64: 1, 4, 1>}, {transform_indices = @transform_3, window_bounds = array<i64: 2, 4, 256>}]} {
    %c0 = arith.constant 0 : index
    %c0_0 = arith.constant 0 : index
    %c0_1 = arith.constant 0 : index
    %0 = vector.load %arg1[%c0, %c0_0, %c0_1] : memref<2x4x256xf32, #tpu.memory_space<vmem>>, vector<2x4x256xf32>
    %cst = arith.constant dense<0.000000e+00> : vector<2x4xf32>
    %1 = vector.multi_reduction <add>, %0, %cst [2] : vector<2x4x256xf32> to vector<2x4xf32>
    %2 = vector.shape_cast %1 : vector<2x4xf32> to vector<2x4x1xf32>
    %cst_2 = arith.constant dense<0.000000e+00> : vector<4x1xf32>
    %3 = vector.multi_reduction <add>, %2, %cst_2 [0] : vector<2x4x1xf32> to vector<4x1xf32>
    %4 = vector.shape_cast %3 : vector<4x1xf32> to vector<1x4x1xf32>
    %cst_3 = arith.constant 5.120000e+02 : f32
    %5 = vector.broadcast %cst_3 : f32 to vector<1x4x1xf32>
    %6 = arith.divf %4, %5 : vector<1x4x1xf32>
    %7 = vector.broadcast %6 : vector<1x4x1xf32> to vector<2x4x256xf32>
    %8 = arith.subf %0, %7 : vector<2x4x256xf32>
    %9 = arith.mulf %8, %8 : vector<2x4x256xf32>
    %cst_4 = arith.constant dense<0.000000e+00> : vector<2x4xf32>
    %10 = vector.multi_reduction <add>, %9, %cst_4 [2] : vector<2x4x256xf32> to vector<2x4xf32>
    %11 = vector.shape_cast %10 : vector<2x4xf32> to vector<2x4x1xf32>
    %cst_5 = arith.constant dense<0.000000e+00> : vector<4x1xf32>
    %12 = vector.multi_reduction <add>, %11, %cst_5 [0] : vector<2x4x1xf32> to vector<4x1xf32>
    %13 = vector.shape_cast %12 : vector<4x1xf32> to vector<1x4x1xf32>
    %cst_6 = arith.constant 5.120000e+02 : f32
    %14 = vector.broadcast %cst_6 : f32 to vector<1x4x1xf32>
    %15 = arith.divf %13, %14 : vector<1x4x1xf32>
    %cst_7 = arith.constant 9.99999974E-6 : f32
    %16 = vector.broadcast %cst_7 : f32 to vector<1x4x1xf32>
    %17 = arith.addf %15, %16 : vector<1x4x1xf32>
    %18 = math.rsqrt %17 : vector<1x4x1xf32>
    %c0_8 = arith.constant 0 : index
    %c0_9 = arith.constant 0 : index
    %c0_10 = arith.constant 0 : index
    %19 = vector.load %arg2[%c0_8, %c0_9, %c0_10] : memref<1x4x1xf32, #tpu.memory_space<vmem>>, vector<1x4x1xf32>
    %20 = arith.mulf %19, %18 : vector<1x4x1xf32>
    %21 = vector.broadcast %20 : vector<1x4x1xf32> to vector<2x4x256xf32>
    %22 = arith.mulf %8, %21 : vector<2x4x256xf32>
    %c0_11 = arith.constant 0 : index
    %c0_12 = arith.constant 0 : index
    %c0_13 = arith.constant 0 : index
    %23 = vector.load %arg3[%c0_11, %c0_12, %c0_13] : memref<1x4x1xf32, #tpu.memory_space<vmem>>, vector<1x4x1xf32>
    %24 = vector.broadcast %23 : vector<1x4x1xf32> to vector<2x4x256xf32>
    %25 = arith.addf %22, %24 : vector<2x4x256xf32>
    %c0_14 = arith.constant 0 : index
    %c0_15 = arith.constant 0 : index
    %c0_16 = arith.constant 0 : index
    %26 = vector.load %arg4[%c0_14, %c0_15, %c0_16] : memref<2x4x256xf32, #tpu.memory_space<vmem>>, vector<2x4x256xf32>
    tpu.vector_store %arg4[%c0_14, %c0_15, %c0_16], %25 {strides = array<i32>} : memref<2x4x256xf32, #tpu.memory_space<vmem>>, vector<2x4x256xf32>,
    return
  }
  func.func @transform_0(%arg0: i32) -> (i32, i32, i32) {
    %c0_i32 = arith.constant 0 : i32
    %c0_i32_0 = arith.constant 0 : i32
    %c0_i32_1 = arith.constant 0 : i32
    return %c0_i32, %arg0, %c0_i32_0 : i32, i32, i32
  }
  func.func @transform_1(%arg0: i32) -> (i32, i32, i32) {
    %c0_i32 = arith.constant 0 : i32
    %c0_i32_0 = arith.constant 0 : i32
    %c0_i32_1 = arith.constant 0 : i32
    return %c0_i32, %arg0, %c0_i32_0 : i32, i32, i32
  }
  func.func @transform_2(%arg0: i32) -> (i32, i32, i32) {
    %c0_i32 = arith.constant 0 : i32
    %c0_i32_0 = arith.constant 0 : i32
    %c0_i32_1 = arith.constant 0 : i32
    return %c0_i32, %arg0, %c0_i32_0 : i32, i32, i32
  }
  func.func @transform_3(%arg0: i32) -> (i32, i32, i32) {
    %c0_i32 = arith.constant 0 : i32
    %c0_i32_0 = arith.constant 0 : i32
    %c0_i32_1 = arith.constant 0 : i32
    return %c0_i32, %arg0, %c0_i32_0 : i32, i32, i32
  }
}

</mosaic_0001>

<bundles_post_ra>
// kernel: tpu_custom_call.1
= control target key start
LH: loop header
LB: loop body
LE: loop exit
PB: predicated region body
PF: predicated region fallthrough
CT: control target
= control target key end

     0   :  { %8 = vsyncpa [#allocation3], 0  ;;  %s272_s0 = inlined_call_operand.hbm [shape: f32[2,4,256], index: 0, kind: input, shape index: {}]   ;;  %s273_s1 = inlined_call_operand.vmem [shape: f32[1,4,1], index: 1, kind: input, shape index: {}]   ;;  %s274_s2 = inlined_call_operand.vmem [shape: f32[1,4,1], index: 2, kind: input, shape index: {}]   ;;  %s275_s3 = inlined_call_operand.hbm [shape: f32[2,4,256], index: 3, kind: output, shape index: {}]  }
   0x1   :  { %9 = vsyncpa [#allocation4], 0  ;;  %s198_s12 = smov [#allocation2]   ;;  %s150_s16 = scalar_lea.hbm %s272_s0, 256 }
   0x2   :  { %s15_s13 = sshll.u32 %s198_s12, 4  ;;  %p151_p0 = scmp.ne.s32.totalorder %s272_s0, %s150_s16  ;;  %s16_s13 = int_to_ptr.vmem [resolvable:$true] %s15_s13 }
   0x3   :  { %p154_p1 = scmp.lt.u32.totalorder %s150_s16, %s272_s0 }
   0x5   :  { %p156_p2 = pnand %p154_p1, %p151_p0 }
   0x7   :  { %159 = shalt.err (!%p156_p2)
}
   0x8   :  { %s160_s21 = scalar_lea.vmem %s16_s13, 256  ;;  %p165_p4 = scmp.lt.s32.totalorder %s16_s13, %s16_s13 }
   0x9   :  { %p161_p3 = scmp.ne.s32.totalorder %s16_s13, %s160_s21  ;;  %p166_p5 = scmp.lt.s32.totalorder %s160_s21, %s160_s21 }
   0xb   :  { %p167_p6 = por %p166_p5, %p165_p4 }
   0xd   :  { %p168_p7 = pnand %p167_p6, %p161_p3 }
   0xf   :  { %171 = shalt.err (!%p168_p7)
}
  0x10   :  { %s199_s22 = smov 128   ;;  %s200_s23 = smov 8  }
  0x11   :  { %21 = dma.hbm_to_vmem [thread:$0]  %s272_s0, 256, %s16_s13, [#allocation3], %s199_s22, %s199_s22, %s200_s23  }
  0x12   :  { %194 = dma.done.wait [#allocation3], 256  }
  0x13   :  { %195 = vsyncadd [#allocation3], 4294967040  ;;  %vm37_vm0 = vcmask 1043456   ;;  %v29_v0 = vld [vmem:[#allocation2] sm:$0xff]  ;;  %v30_v1 = vld [vmem:[#allocation2 + $0x8] sm:$0xff]  ;;  %v57_v12 = vlaneseq  ;;  %v202_v35 = vmov 0  }
  0x14   :  { %v33_v2 = vcombine.high %v29_v0, %v29_v0  ;;  %v38_v3 = vsel %vm37_vm0, %v29_v0, 0.0  ;;  %v34_v4 = vcombine.high %v30_v1, %v30_v1  ;;  %v43_v6 = vsel %vm37_vm0, %v30_v1, 0.0  ;;  %144 = vset.pattern.permute.xlu0 %v202_v35  ;;  %145 = vset.pattern.permute.xlu1 %v202_v35  ;;  %v104_v36 = vld [vmem:[%s274_s2] sm:$0xf]  ;;  %s203_s2 = smov [#allocation5]  }
  0x15   :  { %v201_v10 = vmov 839922192   ;;  %v58_v15 = vshrl.u32 %v57_v12, 7  ;;  %v88_v44 = vld [vmem:[%s273_s1] sm:$0xf]  ;;  %s126_s29 = sshll.u32 %s203_s2, 4  ;;  %s127_s29 = int_to_ptr.vmem [resolvable:$true] %s126_s29 }
  0x16   :  { %v39_v5 = vsel %vm37_vm0, %v33_v2, 0.0  ;;  %v44_v7 = vsel %vm37_vm0, %v34_v4, 0.0  ;;  %v55_v11 = vunpack.c.l.s4 %v201_v10  ;;  %s172_s30 = scalar_lea.vmem %s127_s29, 256  ;;  %p177_p9 = scmp.lt.s32.totalorder %s127_s29, %s127_s29 }
  0x17   :  { %v40_v8 = vadd.f32 %v39_v5, %v38_v3  ;;  %v45_v9 = vadd.f32 %v44_v7, %v43_v6  ;;  %p173_p8 = scmp.ne.s32.totalorder %s127_s29, %s172_s30  ;;  %p178_p10 = scmp.lt.s32.totalorder %s172_s30, %s172_s30 }
  0x18   :  { %v56_v14 = vunpack.c.0.s8 %v55_v11 }
  0x19   :  { %41 = vadd.xlane.f32.xlu0 %v40_v8  ;;  %p179_p11 = por %p178_p10, %p177_p9 }
  0x1a   :  { %v59_v19 = vsub.s32 %v56_v14, %v58_v15 }
  0x1b   :  { %p180_p12 = pnand %p179_p11, %p173_p8 }
  0x1d   :  { %46 = vadd.xlane.f32.xlu0 %v45_v9 }
  0xa6   :  { %v42_v13 = vpop.xlane.xlu0 %41 }
  0xa7   :  { %v48_v17 = vsel %vm37_vm0, %v42_v13, 0.0 }
  0xaa   :  { %v47_v16 = vpop.xlane.xlu0 %46 }
  0xab   :  { %v49_v18 = vsel %vm37_vm0, %v47_v16, 0.0 }
  0xac   :  { %v50_v20 = vadd.f32 %v49_v18, %v48_v17 }
  0xae   :  { %v52_v21 = vmul.f32 0.001953125, %v50_v20 }
  0xb0   :  { %v60_v22 = vrot.slane %v52_v21, %v59_v19 }
  0xb2   :  { %v63_v23 = vsub.f32 %v30_v1, %v60_v22  ;;  %v62_v24 = vsub.f32 %v29_v0, %v60_v22 }
  0xb4   :  { %v64_v25 = vmul.f32 %v62_v24, %v62_v24  ;;  %v65_v26 = vmul.f32 %v63_v23, %v63_v23 }
  0xb6   :  { %v68_v27 = vcombine.high %v64_v25, %v64_v25  ;;  %v69_v28 = vcombine.high %v65_v26, %v65_v26  ;;  %v72_v29 = vsel %vm37_vm0, %v64_v25, 0.0  ;;  %v77_v33 = vsel %vm37_vm0, %v65_v26, 0.0 }
  0xb8   :  { %v73_v30 = vsel %vm37_vm0, %v68_v27, 0.0  ;;  %v78_v32 = vsel %vm37_vm0, %v69_v28, 0.0 }
  0xb9   :  { %v74_v31 = vadd.f32 %v73_v30, %v72_v29  ;;  %v79_v34 = vadd.f32 %v78_v32, %v77_v33 }
  0xbb   :  { %75 = vadd.xlane.f32.xlu1 %v74_v31 }
  0xbf   :  { %80 = vadd.xlane.f32.xlu1 %v79_v34 }
  0xd0   :  { %107 = vperm.xlu1 %145, %v104_v36  }
 0x148   :  { %v76_v37 = vpop.xlane.xlu1 %75 }
 0x149   :  { %v82_v39 = vsel %vm37_vm0, %v76_v37, 0.0 }
 0x14c   :  { %v81_v38 = vpop.xlane.xlu1 %80 }
 0x14d   :  { %v83_v40 = vsel %vm37_vm0, %v81_v38, 0.0 }
 0x14e   :  { %v84_v41 = vadd.f32 %v83_v40, %v82_v39 }
 0x150   :  { %v85_v42 = vmul.f32 0.001953125, %v84_v41  ;;  %v108_v47 = vpop.permute.xlu1 %107 }
 0x151   :  { %v115_v50 = vrot.slane %v108_v47, %v59_v19 }
 0x152   :  { %v86_v43 = vadd.f32 1e-05, %v85_v42 }
 0x154   :  { %148 = vrsqrt.f32 %v86_v43 }
 0x15e   :  { %v149_v45 = vpop.eup %148 }
 0x15f   :  { %v89_v46 = vmul.f32 %v149_v45, %v88_v44 }
 0x161   :  { %92 = vperm.xlu0 %144, %v89_v46  }
 0x1e0   :  { %v93_v48 = vpop.permute.xlu0 %92 }
 0x1e1   :  { %v100_v49 = vrot.slane %v93_v48, %v59_v19 }
 0x1e3   :  { %v102_v51 = vmul.f32 %v100_v49, %v62_v24  ;;  %v103_v52 = vmul.f32 %v100_v49, %v63_v23 }
 0x1e5   :  { %v117_v53 = vadd.f32 %v115_v50, %v102_v51  ;;  %v118_v54 = vadd.f32 %v115_v50, %v103_v52 }
 0x1e7   :  { %119 = vst [vmem:[#allocation5] sm:$0xff] %v117_v53  ;;  %120 = vst [vmem:[#allocation5 + $0x8] sm:$0xff] %v118_v54 }
 0x1e8   :  { %183 = shalt.err (!%p180_p12)
}
 0x1e9   :  { %s184_s5 = scalar_lea.hbm %s275_s3, 256 }
 0x1ea   :  { %p185_p13 = scmp.ne.s32.totalorder %s275_s3, %s184_s5  ;;  %p188_p0 = scmp.lt.u32.totalorder %s184_s5, %s275_s3 }
 0x1ec   :  { %p190_p1 = pnand %p188_p0, %p185_p13 }
 0x1ee   :  { %193 = shalt.err (!%p190_p1)
}
 0x1ef   :  { %132 = dma.vmem_to_hbm [thread:$0]  %s127_s29, 256, %s275_s3, [#allocation4], %s199_s22, %s199_s22, %s200_s23  }
 0x1f0   :  { %196 = dma.done.wait [#allocation4], 256  }
 0x1f1   :  { %197 = vsyncadd [#allocation4], 4294967040 }
 0x1f2   :  { %136 = vsyncpa [#allocation3], 1 }
 0x1f3   :  { %137 = vsyncpa [#allocation4], 1 }

</bundles_post_ra>
